<compile_context>
chip_gen: v7x
topology: tpu7x:2x2x1
jax: 0.10.0
libtpu: 0.0.40
codegen_flags: <defaults>
</compile_context>

<pallas_src>
import functools

import jax
import jax.numpy as jnp
from jax import lax
from jax.experimental import pallas as pl
from jax.experimental.pallas import tpu as pltpu


def _round_up(x, m):
    return ((x + m - 1) // m) * m


def _choose_tiles(n_rows, block_rows):
    """Pick (tm, n_pad, num_tiles) for the flattened B*T row axis."""
    assert block_rows >= 8
    n8 = _round_up(n_rows, 8)
    tm_max = min(_round_up(block_rows, 8), n8)

    # Largest multiple-of-8 divisor of n8 that is <= tm_max (gives N_pad == n8).
    tm_div = tm_max
    while n8 % tm_div:
        tm_div -= 8

    # Prefer the exact divisor only if it keeps tiles reasonably large; otherwise
    # keep the big tile and pad the row count (waste < tm rows of output).
    tm = tm_div if tm_div * 2 >= tm_max else tm_max
    n_pad = _round_up(n8, tm)
    num_tiles = n_pad // tm

    # v7x megacore: avoid a single-tile grid when we can split it evenly.
    if num_tiles == 1 and tm >= 16:
        half = _round_up(tm // 2, 8)
        while half >= 8 and n8 % half:
            half -= 8
        if half >= 8:
            tm = half
            n_pad = n8
            num_tiles = n_pad // tm
    return tm, n_pad, num_tiles


# ----------------------------------------------------------------------------- kernels
def _vocab_iota_and_onehot(idx, v_pad, dtype):
    # idx: (1, tm) lane-dense token ids.  Returns vocab-major iota + one-hot
    # (vocab id along sublanes) so the lane-dense ids broadcast with no relayout.
    tm = idx.shape[1]
    vocab_t = lax.broadcasted_iota(jnp.int32, (v_pad, tm), 0)   # (V_pad, tm)
    return vocab_t, (idx == vocab_t).astype(dtype)


def _tile_nll_sum(lt, tgt, vocab_t, tile_row0, n_valid, v_valid):
    # lt: (V_pad, tm) vocab-major f32 logits; tgt: (1, tm) lane-dense targets.
    tm = lt.shape[1]
    lt_masked = jnp.where(vocab_t < v_valid, lt, jnp.float32(-1e30))
    m = jnp.max(lt_masked, axis=0, keepdims=True)                       # (1, tm)
    lse = m + jnp.log(jnp.sum(jnp.exp(lt_masked - m), axis=0, keepdims=True))
    tgt_logit = jnp.sum((tgt == vocab_t).astype(jnp.float32) * lt,
                        axis=0, keepdims=True)                          # (1, tm)
    nll = lse - tgt_logit
    # Mask rows that only exist because N was padded up.
    rows = lax.broadcasted_iota(jnp.int32, (1, tm), 1) + tile_row0
    return jnp.sum(jnp.where(rows < n_valid, nll, jnp.float32(0.0)))


def _embed_kernel(idx_ref, table_ref, logits_ref):
    # idx_ref: (1,1,tm) int32; table_ref: (V_pad,V_pad) resident; logits_ref: (tm,V_pad) f32.
    idx = idx_ref[0]                                                    # (1, tm)
    v_pad = table_ref.shape[0]
    _, one_hot_t = _vocab_iota_and_onehot(idx, v_pad, table_ref.dtype)  # (V_pad, tm)
    logits_ref[...] = lax.dot_general(
        one_hot_t, table_ref[...],
        dimension_numbers=(((0,), (0,)), ((), ())),
        preferred_element_type=jnp.float32)                             # (tm, V_pad)


def _embed_xent_kernel(idx_ref, tgt_ref, table_ref, logits_ref, loss_ref, *,
                       n_valid, v_valid):
    idx = idx_ref[0]                                                    # (1, tm)
    tgt = tgt_ref[0]                                                    # (1, tm)
    v_pad = table_ref.shape[0]
    tm = idx.shape[1]
    vocab_t, one_hot_t = _vocab_iota_and_onehot(idx, v_pad, table_ref.dtype)

    # MXU pass #1: row-major logits for the lane-dense output tile.
    logits_ref[...] = lax.dot_general(
        one_hot_t, table_ref[...],
        dimension_numbers=(((0,), (0,)), ((), ())),
        preferred_element_type=jnp.float32)                             # (tm, V_pad)

    # MXU pass #2: vocab-major logits for the loss math (replaces the old XLU
    # transpose of the (tm,128) tile; MXU has slack, XLU was near-critical).
    lt = lax.dot_general(
        table_ref[...], one_hot_t,
        dimension_numbers=(((0,), (0,)), ((), ())),
        preferred_element_type=jnp.float32)                             # (V_pad, tm)

    loss_ref[0, 0] = _tile_nll_sum(lt, tgt, vocab_t,
                                   pl.program_id(0) * tm, n_valid, v_valid)


def _xent_loss_only_kernel(idx_ref, tgt_ref, table_ref, loss_ref, *,
                           n_valid, v_valid):
    # Loss-only fast path: no logits writeback at all (the dominant HBM traffic).
    idx = idx_ref[0]
    tgt = tgt_ref[0]
    v_pad = table_ref.shape[0]
    tm = idx.shape[1]
    vocab_t, one_hot_t = _vocab_iota_and_onehot(idx, v_pad, table_ref.dtype)
    lt = lax.dot_general(
        table_ref[...], one_hot_t,
        dimension_numbers=(((0,), (0,)), ((), ())),
        preferred_element_type=jnp.float32)                             # (V_pad, tm)
    loss_ref[0, 0] = _tile_nll_sum(lt, tgt, vocab_t,
                                   pl.program_id(0) * tm, n_valid, v_valid)


# ----------------------------------------------------------------------------- wrapper
def pad_table(table, *, bf16_matmul=False):
    """Zero-pad the (V, V) embedding table to (V_pad, V_pad), V_pad = roundup(V, 128).

    Call this ONCE outside the training/generation loop (hoists the pad/scatter
    launch out of the per-step hot path). bf16_matmul=True stores the table in
    bf16 so the MXU pass runs natively at bf16 (logits are bf16-rounded).
    """
    v = table.shape[0]
    v_pad = _round_up(v, 128)
    dt = jnp.bfloat16 if bf16_matmul else jnp.float32
    return jnp.zeros((v_pad, v_pad), dt).at[:v, :v].set(table.astype(dt))


def _to_blocks(tokens, n, n_pad, num_tiles, tm):
    flat = tokens.reshape(-1).astype(jnp.int32)
    if n_pad != n:  # only scatter-pad when actually needed
        flat = jnp.zeros((n_pad,), jnp.int32).at[:n].set(flat)
    return flat.reshape(num_tiles, 1, tm)


def bigram_forward(table_padded, vocab_size, idx, targets=None, *,
                   block_rows=1024, return_logits=True, padded_logits=False):
    """Pallas equivalent of BigramLM.forward.

    table_padded: (V_pad, V_pad) f32/bf16 table from pad_table()
    idx, targets: (B, T) int token ids in [0, vocab_size)
    Returns (logits_(B,T,V), None) or (logits_(B*T,V), loss). With
    return_logits=False returns (None, loss) and skips the logits HBM writeback.
    padded_logits=True returns the lane-dense 128-wide logits (caller fuses the
    vocab slice downstream) to avoid an extra XLA copy of the whole array.
    """
    V = vocab_size
    V_pad = table_padded.shape[0]
    assert table_padded.shape == (V_pad, V_pad) and V_pad % 128 == 0 and V <= V_pad
    B, T = idx.shape
    N = B * T
    tm, N_pad, num_tiles = _choose_tiles(N, block_rows)

    idx_blk = _to_blocks(idx, N, N_pad, num_tiles, tm)
    idx_spec = pl.BlockSpec((1, 1, tm), lambda i: (i, 0, 0))
    tab_spec = pl.BlockSpec((V_pad, V_pad), lambda i: (0, 0))       # VMEM-resident
    logits_spec = pl.BlockSpec((tm, V_pad), lambda i: (i, 0))       # lane-dense
    loss_spec = pl.BlockSpec((1, 1), lambda i: (i, 0), memory_space=pltpu.SMEM)
    cparams = pltpu.CompilerParams(dimension_semantics=("parallel",))

    if targets is None:
        logits_p = pl.pallas_call(
            _embed_kernel,
            out_shape=jax.ShapeDtypeStruct((N_pad, V_pad), jnp.float32),
            grid=(num_tiles,),
            in_specs=[idx_spec, tab_spec],
            out_specs=logits_spec,
            compiler_params=cparams,
        )(idx_blk, table_padded)
        out = logits_p if N_pad == N else logits_p[:N]
        if padded_logits:
            return out.reshape(B, T, V_pad), None
        return out[:, :V].reshape(B, T, V), None

    tgt_blk = _to_blocks(targets, N, N_pad, num_tiles, tm)

    if not return_logits:
        kernel = functools.partial(_xent_loss_only_kernel, n_valid=N, v_valid=V)
        loss_parts = pl.pallas_call(
            kernel,
            out_shape=jax.ShapeDtypeStruct((num_tiles, 1), jnp.float32),
            grid=(num_tiles,),
            in_specs=[idx_spec, idx_spec, tab_spec],
            out_specs=loss_spec,
            compiler_params=cparams,
        )(idx_blk, tgt_blk, table_padded)
        return None, jnp.sum(loss_parts) / jnp.float32(N)

    kernel = functools.partial(_embed_xent_kernel, n_valid=N, v_valid=V)
    logits_p, loss_parts = pl.pallas_call(
        kernel,
        out_shape=(jax.ShapeDtypeStruct((N_pad, V_pad), jnp.float32),
                   jax.ShapeDtypeStruct((num_tiles, 1), jnp.float32)),
        grid=(num_tiles,),
        in_specs=[idx_spec, idx_spec, tab_spec],
        out_specs=(logits_spec, loss_spec),
        compiler_params=cparams,
    )(idx_blk, tgt_blk, table_padded)
    loss = jnp.sum(loss_parts) / jnp.float32(N)
    out = logits_p if N_pad == N else logits_p[:N]
    if not padded_logits:
        out = out[:, :V]
    return out, loss


class BigramLM:
    """Mirrors the PyTorch module; pads the embedding table once at construction."""

    def __init__(self, table, *, bf16_matmul=False, block_rows=1024):
        self.vocab_size = int(table.shape[0])
        self.block_rows = block_rows
        self.table_padded = pad_table(table, bf16_matmul=bf16_matmul)

    def __call__(self, idx, targets=None, *, return_logits=True, padded_logits=False):
        return bigram_forward(self.table_padded, self.vocab_size, idx, targets,
                              block_rows=self.block_rows,
                              return_logits=return_logits,
                              padded_logits=padded_logits)

    # TODO(synk): generate() (autoregressive multinomial sampling loop) is host-side
    # control flow around repeated forward calls, not a kernel hot path; omitted.


if __name__ == "__main__":
    VOCAB = 65   # tiny-shakespeare-like vocab
    B, T = 2, 8

    key = jax.random.PRNGKey(0)
    k_tab, k_idx, k_tgt = jax.random.split(key, 3)

    # nn.Embedding default init ~ N(0, 1)
    table = jax.random.normal(k_tab, (VOCAB, VOCAB), dtype=jnp.float32)
    idx = jax.random.randint(k_idx, (B, T), 0, VOCAB, dtype=jnp.int32)
    targets = jax.random.randint(k_tgt, (B, T), 0, VOCAB, dtype=jnp.int32)

    model = BigramLM(table)          # table padded once here (hoisted)

    # targets=None path (grid is split into >=2 tiles for megacore even at N=16)
    logits_bt, none_loss = model(idx, None)
    logits_bt = jax.block_until_ready(logits_bt)
    assert logits_bt.shape == (B, T, VOCAB) and none_loss is None

    # targets path: logits + loss
    logits, loss = model(idx, targets)
    logits, loss = jax.block_until_ready((logits, loss))
    assert logits.shape == (B * T, VOCAB)
    assert loss.shape == ()

    # loss-only fast path (no logits HBM writeback)
    _, loss_only = model(idx, targets, return_logits=False)
    loss_only = jax.block_until_ready(loss_only)

    # padded-logits path (no wrapper-side vocab slice)
    logits_pad, loss_pad = model(idx, targets, padded_logits=True)
    logits_pad, loss_pad = jax.block_until_ready((logits_pad, loss_pad))
    assert logits_pad.shape == (B * T, 128)

    # pure-JAX reference
    ref_logits = table[idx.reshape(-1)]
    ref_lp = jax.nn.log_softmax(ref_logits, axis=-1)
    ref_loss = -jnp.mean(ref_lp[jnp.arange(B * T), targets.reshape(-1)])
    assert jnp.allclose(logits, ref_logits, atol=1e-5, rtol=1e-5)
    assert jnp.allclose(logits_bt.reshape(B * T, VOCAB), ref_logits,
                        atol=1e-5, rtol=1e-5)
    assert jnp.allclose(logits_pad[:, :VOCAB], ref_logits, atol=1e-5, rtol=1e-5)
    assert jnp.allclose(loss, ref_loss, atol=1e-5, rtol=1e-5)
    assert jnp.allclose(loss_only, ref_loss, atol=1e-5, rtol=1e-5)
    assert jnp.allclose(loss_pad, ref_loss, atol=1e-5, rtol=1e-5)

    # bf16 MXU variant (v7x-oriented): one-hot exact in bf16, table bf16-rounded.
    model_bf16 = BigramLM(table, bf16_matmul=True)
    logits_b16, loss_b16 = model_bf16(idx, targets)
    logits_b16, loss_b16 = jax.block_until_ready((logits_b16, loss_b16))
    assert jnp.allclose(logits_b16, ref_logits, atol=3e-2, rtol=0)
    assert jnp.allclose(loss_b16, ref_loss, atol=3e-2, rtol=0)

    print("KERNEL_OK")
</pallas_src>

<mosaic_0001>
module attributes {stable_mosaic.version = 11 : i64} {
  func.func @_embed_kernel(%arg0: i32, %arg1: memref<1x1x8xi32, #tpu.memory_space<vmem>>, %arg2: memref<128x128xf32, #tpu.memory_space<vmem>>, %arg3: memref<8x128xf32, #tpu.memory_space<vmem>>) attributes {dimension_semantics = [#tpu.dimension_semantics<parallel>], iteration_bounds = array<i64: 2>, scalar_prefetch = 0 : i64, scratch_operands = 0 : i64, tpu.core_type = #tpu.core_type<tc>, window_params = [{transform_indices = @transform_0, window_bounds = array<i64: 1, 1, 8>}, {pipeline_mode = #tpu.pipeline_mode<synchronous>, transform_indices = @transform_1, window_bounds = array<i64: 128, 128>}, {transform_indices = @transform_2, window_bounds = array<i64: 8, 128>}]} {
    %c0 = arith.constant 0 : index
    %c0_0 = arith.constant 0 : index
    %c0_1 = arith.constant 0 : index
    %0 = vector.load %arg1[%c0, %c0_0, %c0_1] : memref<1x1x8xi32, #tpu.memory_space<vmem>>, vector<1x1x8xi32>
    %1 = vector.shape_cast %0 : vector<1x1x8xi32> to vector<1x8xi32>
    %2 = tpu.iota {dimensions = array<i32: 0>} : vector<128x8xi32>
    %3 = vector.broadcast %1 : vector<1x8xi32> to vector<128x8xi32>
    %4 = arith.cmpi eq, %3, %2 : vector<128x8xi32>
    %5 = arith.extui %4 : vector<128x8xi1> to vector<128x8xi32>
    %6 = arith.sitofp %5 : vector<128x8xi32> to vector<128x8xf32>
    %c0_2 = arith.constant 0 : index
    %c0_3 = arith.constant 0 : index
    %7 = vector.load %arg2[%c0_2, %c0_3] : memref<128x128xf32, #tpu.memory_space<vmem>>, vector<128x128xf32>
    %cst = arith.constant dense<0.000000e+00> : vector<8x128xf32>
    %8 = tpu.matmul %6, %7, %cst {dimension_numbers = #tpu.dot_dimension_numbers<[0], [0], [1], [1], [0, 1, 1, 1], [], []>} : vector<128x8xf32>, vector<128x128xf32>, vector<8x128xf32> -> vector<8x128xf32>
    %c0_4 = arith.constant 0 : index
    %c0_5 = arith.constant 0 : index
    %9 = vector.load %arg3[%c0_4, %c0_5] : memref<8x128xf32, #tpu.memory_space<vmem>>, vector<8x128xf32>
    tpu.vector_store %arg3[%c0_4, %c0_5], %8 {strides = array<i32>} : memref<8x128xf32, #tpu.memory_space<vmem>>, vector<8x128xf32>,
    return
  }
  func.func @transform_0(%arg0: i32) -> (i32, i32, i32) {
    %c0_i32 = arith.constant 0 : i32
    %c0_i32_0 = arith.constant 0 : i32
    %c0_i32_1 = arith.constant 0 : i32
    return %arg0, %c0_i32, %c0_i32_0 : i32, i32, i32
  }
  func.func @transform_1(%arg0: i32) -> (i32, i32) {
    %c0_i32 = arith.constant 0 : i32
    %c0_i32_0 = arith.constant 0 : i32
    %c0_i32_1 = arith.constant 0 : i32
    return %c0_i32, %c0_i32_0 : i32, i32
  }
  func.func @transform_2(%arg0: i32) -> (i32, i32) {
    %c0_i32 = arith.constant 0 : i32
    %c0_i32_0 = arith.constant 0 : i32
    return %arg0, %c0_i32 : i32, i32
  }
}

</mosaic_0001>

<bundles_post_ra>
// kernel: tpu_custom_call.1
= control target key start
LH: loop header
LB: loop body
LE: loop exit
PB: predicated region body
PF: predicated region fallthrough
CT: control target
= control target key end

     0   :  { %7 = vsyncpa [#allocation3], 0  ;;  %s1029_s0 = inlined_call_operand.hbm [shape: s32[2,1,8], index: 0, kind: input, shape index: {}]   ;;  %s1030_s1 = inlined_call_operand.hbm [shape: f32[128,128], index: 1, kind: input, shape index: {}]   ;;  %s1031_s2 = inlined_call_operand.hbm [shape: f32[16,128], index: 2, kind: output, shape index: {}]  }
   0x1   :  { %9 = vsyncpa [#allocation3 + $0x1], 0 }
   0x2   :  { %10 = vsyncpa [#allocation6], 0 }
   0x3   :  { %11 = vsyncpa [#allocation4], 0 }
   0x4   :  { %13 = vsyncpa [#allocation4 + $0x1], 0  ;;  %s771_s9 = smov 0   ;;  %s773_s10 = smov 0  }
   0x5   :  { %s775_s11 = smov 0   ;;  %s777_s12 = smov 0  }
   0x6 LB: > { %s792_s13 = sadd.s32 4294967295, %s746_s12   ;;  %s451_s14 = sadd.s32 4294967294, %s746_s12   ;;  %s746_s12 = sphi %s777_s12, %s1051_s12   ;;  %s742_s11 = sphi %s775_s11, %s1050_s11   ;;  %s738_s10 = sphi %s773_s10, %s1049_s10   ;;  %s734_s9 = sphi %s771_s9, %s1048_s9  }
   0x7   : > { %p39_p0 = scmp.ne.s32.totalorder %s738_s10, %s734_s9  ;;  %p1032_p1 = scmp.eq.s32.totalorder %s792_s13, 0 }
   0x8   : > { %p90_p3 = scmp.eq.s32.totalorder %s451_s14, 1  ;;  %p452_p5 = scmp.ge.s32.totalorder %s746_s12, 1 }
   0x9   : > { %p801_p4 = por %p1032_p1, %p39_p0  ;;  %p97_p7 = scmp.lt.s32.totalorder %s746_s12, 3 }
   0xa   : > { %p806_p6 = por %p90_p3, %p39_p0  ;;  %s748_s18 = smov [#allocation5]  }
   0xb   : > { %s1035_s15 = scalar_select %p801_p4, 1, 0 }
   0xc   : > { %s1036_s16 = scalar_select %p806_p6, 1, 0 }
   0xd   : > { %p811_p8 = pnand %p452_p5, %p97_p7  ;;  %s109_s19 = sshll.u32 %s748_s18, 4  ;;  %s815_s19 = int_to_ptr.vmem [resolvable:$true] %s109_s19 }
   0xe   : > { %s827_s21 = sadd.s32 1, %s746_s12   ;;  %s26_s22 = sadd.s32 1, %s742_s11 }
   0xf   : > { %s1037_s17 = scalar_select %p811_p8, 1, 0 }
  0x10   : > { %p564_p9 = pneg %p811_p8  ;;  %s23_s23 = ssub.s32 %s746_s12, %s827_s21 }
  0x11   : > { %s618_s26 = scalar_lea.hbm %s1030_s1, 2048 }
  0x12   : > { %p822_p11 = pnand %p564_p9, %p1032_p1  ;;  %p619_p12 = scmp.ne.s32.totalorder %s1030_s1, %s618_s26 }
  0x13   : > { %p625_p5 = scmp.lt.u32.totalorder %s618_s26, %s1030_s1 }
  0x14   : > { %p620_p13 = pneg %p822_p11 }
  0x16   : > { %p621_p0 = pnand %p620_p13, %p619_p12 }
  0x18   : > { %p622_p3 = pneg %p621_p0 }
  0x1a   : > { %p627_p7 = pnand %p625_p5, %p622_p3 }
  0x1c   : > { %630 = shalt.err (!%p627_p7)
}
  0x1d   : > { %s631_s3 = scalar_lea.vmem %s815_s19, 2048  ;;  %p639_p2 = scmp.lt.s32.totalorder %s815_s19, %s815_s19 }
  0x1e   : > { %p632_p9 = scmp.ne.s32.totalorder %s815_s19, %s631_s3  ;;  %p640_p6 = scmp.lt.s32.totalorder %s631_s3, %s631_s3 }
  0x20   : > { %p634_p10 = pnand %p632_p9, %p620_p13  ;;  %p641_p4 = por %p640_p6, %p639_p2 }
  0x22   : > { %p635_p1 = pneg %p634_p10 }
  0x24   : > { %p642_p8 = pnand %p641_p4, %p635_p1 }
  0x26   : > { %645 = shalt.err (!%p642_p8)
}
  0x27   : > { %s749_s4 = smov 128   ;;  %s750_s5 = smov 8  }
  0x28   : > { %567 = dma.hbm_to_vmem [thread:$0]  (!%p822_p11), %s1030_s1, 2048, %s815_s19, [#allocation6], %s749_s4, %s749_s4, %s750_s5  }
  0x29   : > { %p24_p2 = scmp.eq.s32.totalorder %s23_s23, 0  ;;  %p33_p1 = scmp.ne.s32.totalorder %s742_s11, %s738_s10 }
  0x2a   : > { %p34_p4 = scmp.eq.s32.totalorder %s746_s12, 0  ;;  %p577_p6 = scmp.lt.s32.totalorder %s746_s12, 2 }
  0x2b   : > { %s858_s8 = scalar_select %p24_p2, %s742_s11, %s26_s22  }
  0x2c   : > { %p35_p8 = por %p34_p4, %p33_p1  ;;  %p1039_p10 = scmp.eq.s32.totalorder %s792_s13, 1 }
  0x2d   : > { %s123_s18 = sand.u32 1, %s742_s11   ;;  %s455_s24 = sshll.u32 %s746_s12, 4 }
  0x2e   : > { %p862_p12 = por %p1039_p10, %p33_p1  ;;  %s871_s26 = scalar_lea.hbm %s1029_s0, %s455_s24 }
  0x2f   : > { %s126_s19 = scalar_lea.vmem [#allocation2], %s123_s18  ;;  %p875_p11 = pnand %p577_p6, %p35_p8 }
  0x30   : > { %s133_s22 = sshll.u32 %s126_s19, 4  ;;  %s124_s27 = scalar_lea.sflag [#allocation3], %s123_s18  ;;  %s873_s22 = int_to_ptr.vmem [resolvable:$true] %s133_s22 }
  0x31   : > { %s646_s28 = scalar_lea.hbm %s871_s26, 16  ;;  %p648_p0 = pneg %p875_p11 }
  0x32   : > { %p647_p13 = scmp.ne.s32.totalorder %s871_s26, %s646_s28  ;;  %s651_s3 = scalar_lea.hbm %s1029_s0, 32 }
  0x33   : > { %p652_p7 = scmp.lt.u32.totalorder %s871_s26, %s1029_s0  ;;  %p653_p9 = scmp.lt.u32.totalorder %s651_s3, %s646_s28 }
  0x34   : > { %p649_p3 = pnand %p648_p0, %p647_p13  ;;  %p655_p1 = scmp.lt.u32.totalorder %s646_s28, %s871_s26 }
  0x35   : > { %p654_p2 = por %p653_p9, %p652_p7 }
  0x36   : > { %p650_p5 = pneg %p649_p3 }
  0x37   : > { %p656_p4 = por %p655_p1, %p654_p2 }
  0x39   : > { %p657_p6 = pnand %p656_p4, %p650_p5 }
  0x3b   : > { %660 = shalt.err (!%p657_p6)
}
  0x3c   : > { %s661_s6 = scalar_lea.vmem %s873_s22, 16  ;;  %s751_s7 = smov [#allocation2]  }
  0x3d   : > { %p662_p8 = scmp.ne.s32.totalorder %s873_s22, %s661_s6  ;;  %s666_s18 = sshll.u32 %s751_s7, 4  ;;  %s667_s18 = int_to_ptr.vmem [resolvable:$false] %s666_s18 }
  0x3e   : > { %s668_s24 = scalar_lea.vmem %s667_s18, 32  ;;  %p669_p3 = scmp.lt.s32.totalorder %s873_s22, %s667_s18 }
  0x3f   : > { %p664_p10 = pnand %p662_p8, %p648_p0  ;;  %p670_p7 = scmp.lt.s32.totalorder %s668_s24, %s661_s6 }
  0x41   : > { %p665_p13 = pneg %p664_p10  ;;  %p671_p9 = por %p670_p7, %p669_p3 }
  0x43   : > { %p672_p2 = pnand %p671_p9, %p665_p13 }
  0x45   : > { %675 = shalt.err (!%p672_p2)
}
  0x46   : > { %571 = dma.hbm_to_vmem [thread:$0]  (!%p875_p11), %s871_s26, 16, %s873_s22, %s124_s27  }
  0x47   : > { %p1042_p5 = scmp.ne.s32.totalorder %s1037_s17, 0 }
  0x48   : > { %s907_s25 = sand.u32 (!%p1042_p5), 1, %s738_s10   ;;  %p1043_p0 = scmp.ne.s32.totalorder (!%p1042_p5), %s1035_s15, 0 }
  0x49   : > { %142 = sbr.rel (%p1042_p5) target bundleno = 445 (0x1bd), region = 28  ;;  %s145_s20 = scalar_lea.sflag (!%p1042_p5), [#allocation3], %s907_s25 }
  0x4a   : > { %s147_s19 = scalar_lea.vmem (!%p1042_p5), [#allocation2], %s907_s25 }
  0x50   : > { %721 = dma.done.wait (%p1043_p0), %s145_s20, 16  }
  0x51   : > { %723 = vsyncadd (%p1043_p0), %s145_s20, 4294967280  ;;  %p1044_p1 = scmp.eq.s32.totalorder %s792_s13, 0 }
  0x53   : > { %725 = dma.done.wait (%p1044_p1), [#allocation6], 2048   ;;  %p1045_p11 = pmov %p1044_p1 }
  0x54   : > { %v172_v0 = vlaneseq  ;;  %v752_v1 = vmov 0.0|0.0   ;;  %v923_v4 = vld [vmem:[%s147_s19] ss:$0 sm:$0xff]  ;;  %v753_v6 = vmov 0.0   ;;  %v241_v10 = vld [vmem:[#allocation5] sm:$0xff]  ;;  %v242_v11 = vld [vmem:[#allocation5 + $0x8] sm:$0xff] }
  0x55   : > { %727 = vsyncadd (%p1045_p11), [#allocation6], 4294965248  ;;  %532 = vmatprep.subr.bf16.mxu0 %v752_v1  ;;  %v243_v13 = vld [vmem:[#allocation5 + $0x10] sm:$0xff]  ;;  %v244_v14 = vld [vmem:[#allocation5 + $0x18] sm:$0xff]  ;;  %v533_v16 = vpack.c.bf16 %v242_v11, %v241_v10  ;;  %vm754_vm4 = vmmov 0   ;;  %s458_s15 = sshll.u32 %s907_s25, 3 }
  0x56   : > { %v920_v2 = vshrl.u32 %v172_v0, 7  ;;  %v536_v17 = vpack.c.bf16 %v244_v14, %v243_v13  ;;  %v245_v19 = vld [vmem:[#allocation5 + $0x20] sm:$0xff]  ;;  %v246_v20 = vld [vmem:[#allocation5 + $0x28] sm:$0xff]  ;;  %529 = vmatprep.mubr.msk.f32.mxu0 %vm754_vm4, %v753_v6  ;;  %v247_v24 = vld [vmem:[#allocation5 + $0x30] sm:$0xff]  ;;  %s170_s17 = scalar_lea.vmem [#allocation7], %s458_s15  ;;  %s477_s22 = sshll.u32 %s792_s13, 7 }
  0x57   : > { %534 = vmatpush3.bf16.msra.mxu0 %v533_v16  ;;  %v539_v22 = vpack.c.bf16 %v246_v20, %v245_v19  ;;  %v248_v25 = vld [vmem:[#allocation5 + $0x38] sm:$0xff]  ;;  %v249_v29 = vld [vmem:[#allocation5 + $0x40] sm:$0xff]  ;;  %v250_v30 = vld [vmem:[#allocation5 + $0x48] sm:$0xff]  ;;  %s374_s26 = sshll.u32 %s170_s17, 4  ;;  %s987_s28 = scalar_lea.hbm %s1031_s2, %s477_s22  ;;  %s982_s26 = int_to_ptr.vmem [resolvable:$true] %s374_s26 }
  0x58   : > { %v174_v3 = vadd.s32 8, %v920_v2  ;;  %vm193_vm0 = vcmp.eq.s32.totalorder %v923_v4, %v920_v2  ;;  %v175_v5 = vadd.s32 16, %v920_v2  ;;  %v176_v9 = vadd.s32 24, %v920_v2  ;;  %535 = vmatprep.subr.bf16.mxu0 %v752_v1  ;;  %v251_v34 = vld [vmem:[#allocation5 + $0x50] sm:$0xff]  ;;  %v252_v35 = vld [vmem:[#allocation5 + $0x58] sm:$0xff]  ;;  %v253_v39 = vld [vmem:[#allocation5 + $0x60] sm:$0xff] }
  0x59   : > { %v460_v7 = vsel %vm193_vm0, 1.0, %v753_v6  ;;  %v177_v15 = vadd.s32 32, %v920_v2  ;;  %v178_v21 = vadd.s32 40, %v920_v2  ;;  %v179_v26 = vadd.s32 48, %v920_v2  ;;  %v254_v40 = vld [vmem:[#allocation5 + $0x68] sm:$0xff]  ;;  %v255_v44 = vld [vmem:[#allocation5 + $0x70] sm:$0xff] }
  0x5a   : > { %vm194_vm1 = vcmp.eq.s32.totalorder %v923_v4, %v174_v3  ;;  %257 = vxpose.xlu0.b32.start [1/16] (narrow) %v460_v7, 8  ;;  %vm195_vm2 = vcmp.eq.s32.totalorder %v923_v4, %v175_v5  ;;  %vm196_vm3 = vcmp.eq.s32.totalorder %v923_v4, %v176_v9  ;;  %v542_v27 = vpack.c.bf16 %v248_v25, %v247_v24  ;;  %v256_v45 = vld [vmem:[#allocation5 + $0x78] sm:$0xff]  ;;  %s361_s29 = scalar_lea.sflag [#allocation4], %s907_s25  ;;  %s676_s30 = scalar_lea.vmem %s982_s26, 128 }
  0x5b   : > { %v461_v8 = vsel %vm194_vm1, 1.0, %v753_v6  ;;  %v462_v12 = vsel %vm195_vm2, 1.0, %v753_v6  ;;  %v463_v18 = vsel %vm196_vm3, 1.0, %v753_v6  ;;  %vm197_vm5 = vcmp.eq.s32.totalorder %v923_v4, %v177_v15  ;;  %537 = vmatpush3.bf16.msra.mxu0 %v536_v17  ;;  %p677_p4 = scmp.ne.s32.totalorder %s982_s26, %s676_s30  ;;  %s755_s13 = smov [#allocation7]  }
  0x5c   : > { %v464_v23 = vsel %vm197_vm5, 1.0, %v753_v6  ;;  %538 = vmatprep.subr.bf16.mxu0 %v752_v1  ;;  %vm198_vm6 = vcmp.eq.s32.totalorder %v923_v4, %v178_v21  ;;  %vm199_vm7 = vcmp.eq.s32.totalorder %v923_v4, %v179_v26  ;;  %v180_v31 = vadd.s32 56, %v920_v2  ;;  %s680_s3 = sshll.u32 %s755_s13, 4  ;;  %s681_s3 = int_to_ptr.vmem [resolvable:$false] %s680_s3 }
  0x5d   : > { %v465_v28 = vsel %vm198_vm6, 1.0, %v753_v6  ;;  %v545_v32 = vpack.c.bf16 %v250_v30, %v249_v29  ;;  %v466_v33 = vsel %vm199_vm7, 1.0, %v753_v6  ;;  %v181_v36 = vadd.s32 64, %v920_v2  ;;  %p678_p6 = pnand %p677_p4, %p862_p12  ;;  %s682_s4 = scalar_lea.vmem %s681_s3, 256 }
  0x5e   : > { %258 = vxpose.xlu0.b32.cont [2/16] (narrow) %v461_v8, 8  ;;  %vm200_vm8 = vcmp.eq.s32.totalorder %v923_v4, %v180_v31  ;;  %v548_v37 = vpack.c.bf16 %v252_v35, %v251_v34  ;;  %v182_v41 = vadd.s32 72, %v920_v2  ;;  %v551_v42 = vpack.c.bf16 %v254_v40, %v253_v39  ;;  %p683_p10 = scmp.lt.s32.totalorder %s982_s26, %s681_s3  ;;  %p684_p13 = scmp.lt.s32.totalorder %s682_s4, %s676_s30 }
  0x5f   : > { %540 = vmatpush3.bf16.msra.mxu0 %v539_v22  ;;  %v467_v38 = vsel %vm200_vm8, 1.0, %v753_v6  ;;  %vm201_vm9 = vcmp.eq.s32.totalorder %v923_v4, %v181_v36  ;;  %v183_v46 = vadd.s32 80, %v920_v2  ;;  %v554_v47 = vpack.c.bf16 %v256_v45, %v255_v44  ;;  %p679_p8 = pneg %p678_p6 }
  0x60   : > { %541 = vmatprep.subr.bf16.mxu0 %v752_v1  ;;  %v468_v43 = vsel %vm201_vm9, 1.0, %v753_v6  ;;  %vm202_vm10 = vcmp.eq.s32.totalorder %v923_v4, %v182_v41  ;;  %v184_v49 = vadd.s32 88, %v920_v2  ;;  %v185_v51 = vadd.s32 96, %v920_v2  ;;  %p685_p3 = por %p684_p13, %p683_p10 }
  0x61   : > { %v469_v48 = vsel %vm202_vm10, 1.0, %v753_v6  ;;  %vm203_vm11 = vcmp.eq.s32.totalorder %v923_v4, %v183_v46  ;;  %v186_v53 = vadd.s32 104, %v920_v2  ;;  %v187_v55 = vadd.s32 112, %v920_v2 }
  0x62   : > { %259 = vxpose.xlu0.b32.cont [3/16] (narrow) %v462_v12, 8  ;;  %v470_v50 = vsel %vm203_vm11, 1.0, %v753_v6  ;;  %vm204_vm12 = vcmp.eq.s32.totalorder %v923_v4, %v184_v49  ;;  %vm205_vm13 = vcmp.eq.s32.totalorder %v923_v4, %v185_v51  ;;  %v188_v57 = vadd.s32 120, %v920_v2  ;;  %p686_p7 = pnand %p685_p3, %p679_p8 }
  0x63   : > { %543 = vmatpush3.bf16.msra.mxu0 %v542_v27  ;;  %v471_v52 = vsel %vm204_vm12, 1.0, %v753_v6  ;;  %v472_v54 = vsel %vm205_vm13, 1.0, %v753_v6  ;;  %vm206_vm14 = vcmp.eq.s32.totalorder %v923_v4, %v186_v53  ;;  %vm207_vm15 = vcmp.eq.s32.totalorder %v923_v4, %v187_v55 }
  0x64   : > { %544 = vmatprep.subr.bf16.mxu0 %v752_v1  ;;  %v473_v56 = vsel %vm206_vm14, 1.0, %v753_v6  ;;  %v474_v58 = vsel %vm207_vm15, 1.0, %v753_v6  ;;  %vm208_vm0 = vcmp.eq.s32.totalorder %v923_v4, %v188_v57 }
  0x65   : > { %v475_v59 = vsel %vm208_vm0, 1.0, %v753_v6 }
  0x66   : > { %260 = vxpose.xlu0.b32.cont [4/16] (narrow) %v463_v18, 8 }
  0x67   : > { %546 = vmatpush3.bf16.msra.mxu0 %v545_v32 }
  0x68   : > { %547 = vmatprep.subr.bf16.mxu0 %v752_v1 }
  0x6a   : > { %261 = vxpose.xlu0.b32.cont [5/16] (narrow) %v464_v23, 8 }
  0x6b   : > { %549 = vmatpush3.bf16.msra.mxu0 %v548_v37 }
  0x6c   : > { %550 = vmatprep.subr.bf16.mxu0 %v752_v1 }
  0x6e   : > { %262 = vxpose.xlu0.b32.cont [6/16] (narrow) %v465_v28, 8 }
  0x6f   : > { %552 = vmatpush3.bf16.msra.mxu0 %v551_v42 }
  0x70   : > { %553 = vmatprep.subr.bf16.mxu0 %v752_v1 }
  0x72   : > { %263 = vxpose.xlu0.b32.cont [7/16] (narrow) %v466_v33, 8 }
  0x73   : > { %555 = vmatpush3.bf16.msra.mxu0 %v554_v47 }
  0x76   : > { %264 = vxpose.xlu0.b32.cont [8/16] (narrow) %v467_v38, 8 }
  0x7a   : > { %265 = vxpose.xlu0.b32.cont [9/16] (narrow) %v468_v43, 8 }
  0x7e   : > { %266 = vxpose.xlu0.b32.cont [10/16] (narrow) %v469_v48, 8 }
  0x82   : > { %267 = vxpose.xlu0.b32.cont [11/16] (narrow) %v470_v50, 8 }
  0x86   : > { %268 = vxpose.xlu0.b32.cont [12/16] (narrow) %v471_v52, 8 }
  0x8a   : > { %269 = vxpose.xlu0.b32.cont [13/16] (narrow) %v472_v54, 8 }
  0x8e   : > { %270 = vxpose.xlu0.b32.cont [14/16] (narrow) %v473_v56, 8 }
  0x92   : > { %271 = vxpose.xlu0.b32.cont [15/16] (narrow) %v474_v58, 8 }
  0x96   : > { %272 = vxpose.xlu0.b32.end [16/16] (narrow) %v475_v59, 8 }
  0xda   : > { %v273_v60 = vpop.trf.xlu0 }
  0xdb   : > { %530 = vmatmul.mubr.f32.vlgmr.msra.gmra.mrb[0].mxu0 %v273_v60 }
 0x1ae   : > { %v355_v61 = vpop.f32.mrb[0].mxu0 }
 0x1af   : > { %359 = vst [vmem:[%s170_s17] sm:$0xff] %v355_v61  ;;  %v531_v62 = vpop.f32.mrb[1].mxu0 }
 0x1b0   : > { %689 = shalt.err (!%p686_p7)
}
 0x1b1   : > { %s690_s5 = scalar_lea.hbm %s987_s28, 128  ;;  %s694_s18 = scalar_lea.hbm %s1031_s2, 256 }
 0x1b2   : > { %p691_p9 = scmp.ne.s32.totalorder %s987_s28, %s690_s5  ;;  %p695_p0 = scmp.lt.u32.totalorder %s987_s28, %s1031_s2 }
 0x1b3   : > { %p696_p1 = scmp.lt.u32.totalorder %s694_s18, %s690_s5  ;;  %p698_p4 = scmp.lt.u32.totalorder %s690_s5, %s987_s28 }
 0x1b4   : > { %p692_p2 = pnand %p691_p9, %p862_p12 }
 0x1b5   : > { %p697_p11 = por %p696_p1, %p695_p0 }
 0x1b6   : > { %p693_p5 = pneg %p692_p2 }
 0x1b7   : > { %p699_p6 = por %p698_p4, %p697_p11 }
 0x1b9   : > { %p700_p8 = pnand %p699_p6, %p693_p5 }
 0x1bb   : > { %703 = shalt.err (!%p700_p8)
}
 0x1bc   : > { %562 = dma.vmem_to_hbm [thread:$0]  (%p862_p12), %s982_s26, 128, %s987_s28, %s361_s29  }
 0x1bd PF: > { %s386_s20 = sand.u32 1, %s734_s9   ;;  %p1046_p10 = scmp.ne.s32.totalorder %s1036_s16, 0 }
 0x1be   : > { %p1047_p13 = scmp.ge.s32.totalorder %s746_s12, 2  ;;  %s387_s19 = scalar_lea.sflag [#allocation4], %s386_s20 }
 0x1c0   : > { %p573_p3 = pnand %p1047_p13, %p1046_p10 }
 0x1c2   : > { %729 = dma.done.wait (!%p573_p3), %s387_s19, 128  }
 0x1c3   : > { %731 = vsyncadd (!%p573_p3), %s387_s19, 4294967168  ;;  %p16_p7 = scmp.ge.s32.totalorder %s827_s21, 4   ;;  %s1048_s9 = smov %s738_s10 }
 0x1c4   : > { %s1049_s10 = smov %s742_s11  ;;  %s1050_s11 = smov %s858_s8 }
 0x1c5   : > { %s1051_s12 = smov %s827_s21  ;;  %18 = sbr.rel (!%p16_p7) target bundleno = 6 (0x6), region = 77 }
 0x1cc   :  { %392 = vsyncpa [#allocation3], 1 }
 0x1cd   :  { %394 = vsyncpa [#allocation3 + $0x1], 1 }
 0x1ce   :  { %395 = vsyncpa [#allocation6], 1 }
 0x1cf   :  { %396 = vsyncpa [#allocation4], 1 }
 0x1d0   :  { %398 = vsyncpa [#allocation4 + $0x1], 1 }

</bundles_post_ra>
